<compile_context>
chip_gen: v6e
topology: v6e:2x2x1
jax: 0.10.0
libtpu: 0.0.40
codegen_flags: <defaults>
</compile_context>

<pallas_src>
import functools

import jax
import jax.numpy as jnp
from jax import lax
from jax.experimental import pallas as pl
from jax.experimental.pallas import tpu as pltpu


def _round_up(a, b):
    return ((a + b - 1) // b) * b


def _make_kernel(n_valid, cb, h, w):
    inv_w2 = 1.0 / float(w * w)
    inv_h2 = 1.0 / float(h * h)

    def kernel(x_ref, coord_ref, out_ref):
        g = pl.program_id(0)

        x = x_ref[...].astype(jnp.float32)            # (Cb, HWp), lane-dense
        gx = coord_ref[0:1, :]                        # centered row (height) coord
        gy = coord_ref[1:2, :]                        # centered col (width) coord
        gx2 = coord_ref[2:3, :]
        gy2 = coord_ref[3:4, :]

        # One-pass weighted moments, vectorized over Cb channels (sublanes),
        # reduced over H*W (lanes).
        s = jnp.sum(x, axis=1, keepdims=True)         # (Cb, 1)
        sx = jnp.sum(x * gx, axis=1, keepdims=True)
        sy = jnp.sum(x * gy, axis=1, keepdims=True)
        sxx = jnp.sum(x * gx2, axis=1, keepdims=True)
        syy = jnp.sum(x * gy2, axis=1, keepdims=True)

        # sum_p ((loc - g_p)^2 m_p) == S2 - S1^2 / S0 (coords centered -> stable).
        inv_s = 1.0 / s                               # matches reference NaN/inf for all-zero maps
        contrib = (sxx - sx * sx * inv_s) * inv_w2 + (syy - sy * sy * inv_s) * inv_h2

        # Zero out rows that are only padding (keeps real zero-map semantics intact).
        row = g * cb + lax.broadcasted_iota(jnp.int32, (cb, 1), 0)
        contrib = jnp.where(row < n_valid, contrib, 0.0)

        part = jnp.sum(contrib, axis=0, keepdims=True)            # (1, 1)
        out_ref[...] = jnp.broadcast_to(part.reshape(1, 1, 1), out_ref.shape)

    return kernel


@functools.partial(jax.jit, static_argnames=())
def concentration_loss(maps):
    """maps: (B, C, H, W) float array. Returns a scalar (float32)."""
    maps = jnp.asarray(maps)
    B, C, H, W = maps.shape
    N = B * (C - 1)                      # last channel is excluded from the mean
    HW = H * W
    HWp = _round_up(HW, 128)             # lane-dense last dim

    # Drop the skipped channel at the boundary and flatten spatial dims.
    flat = maps[:, : C - 1].reshape(N, HW)

    # Channel-block size (sublane axis). Keep the double-buffered input block
    # comfortably inside VMEM (<= ~4 MiB per buffer), important on v7x (64 MiB).
    max_rows_vmem = max(8, (((4 * 1024 * 1024) // (HWp * 4)) // 8) * 8)
    Cb = min(512, _round_up(N, 8), max_rows_vmem)
    Np = _round_up(N, Cb)
    G = Np // Cb

    if Np != N or HWp != HW:
        flat = jnp.pad(flat, ((0, Np - N), (0, HWp - HW)))

    # Resident constant coordinate rows: [gx_c, gy_c, gx_c^2, gy_c^2, 0, 0, 0, 0]
    # (centered coordinates; padded lanes are zero and multiply zero-padded pixels).
    gx2d = jnp.arange(H, dtype=jnp.float32)[:, None] - (H - 1) / 2.0
    gy2d = jnp.arange(W, dtype=jnp.float32)[None, :] - (W - 1) / 2.0
    gx = jnp.broadcast_to(gx2d, (H, W)).reshape(HW)
    gy = jnp.broadcast_to(gy2d, (H, W)).reshape(HW)
    coords = jnp.zeros((8, HWp), jnp.float32)
    coords = coords.at[0, :HW].set(gx).at[1, :HW].set(gy)
    coords = coords.at[2, :HW].set(gx * gx).at[3, :HW].set(gy * gy)

    kernel = _make_kernel(N, Cb, H, W)
    partials = pl.pallas_call(
        kernel,
        out_shape=jax.ShapeDtypeStruct((G, 8, 128), jnp.float32),
        grid_spec=pl.GridSpec(
            grid=(G,),
            in_specs=[
                pl.BlockSpec((Cb, HWp), lambda g: (g, 0)),
                pl.BlockSpec((8, HWp), lambda g: (0, 0)),   # resident constant
            ],
            out_specs=pl.BlockSpec((1, 8, 128), lambda g: (g, 0, 0)),
        ),
        compiler_params=pltpu.CompilerParams(
            dimension_semantics=("parallel",),   # per-block partials -> megacore-safe
        ),
    )(flat, coords)

    total = jnp.sum(partials[:, 0, 0])
    # .mean() over the (B, C-1, H, W) slice.
    return total / jnp.float32(B * (C - 1) * H * W)


def _reference(maps):
    """Pure-JAX reference mirroring the PyTorch forward (two-pass form)."""
    B, C, H, W = maps.shape
    gx = lax.broadcasted_iota(jnp.float32, (H, W), 0)[None, None]
    gy = lax.broadcasted_iota(jnp.float32, (H, W), 1)[None, None]
    m = maps.astype(jnp.float32)
    map_sums = m.sum(axis=(2, 3))
    loc_x = (gx * m).sum(axis=(2, 3)) / map_sums
    loc_y = (gy * m).sum(axis=(2, 3)) / map_sums
    loss_x = ((loc_x[..., None, None] - gx) / W) ** 2
    loss_y = ((loc_y[..., None, None] - gy) / H) ** 2
    loss = (loss_x + loss_y) * m
    return loss[:, :-1].mean()


if __name__ == "__main__":
    key = jax.random.PRNGKey(0)
    B, C, H, W = 2, 4, 16, 16
    # Strictly positive "attention" maps (probability-like), avoiding /0.
    maps = jax.random.uniform(key, (B, C, H, W), dtype=jnp.float32,
                              minval=0.05, maxval=1.0)

    out = jax.block_until_ready(concentration_loss(maps))
    ref = jax.block_until_ready(_reference(maps))
    assert jnp.allclose(out, ref, rtol=1e-5, atol=1e-6), (out, ref)
    print("KERNEL_OK")
</pallas_src>

<mosaic_0001>
module attributes {stable_mosaic.version = 11 : i64} {
  func.func @kernel(%arg0: i32, %arg1: memref<8x256xf32, #tpu.memory_space<vmem>>, %arg2: memref<8x256xf32, #tpu.memory_space<vmem>>, %arg3: memref<1x8x128xf32, #tpu.memory_space<vmem>>) attributes {dimension_semantics = [#tpu.dimension_semantics<parallel>], iteration_bounds = array<i64: 1>, scalar_prefetch = 0 : i64, scratch_operands = 0 : i64, tpu.core_type = #tpu.core_type<tc>, window_params = [{transform_indices = @transform_0, window_bounds = array<i64: 8, 256>}, {pipeline_mode = #tpu.pipeline_mode<synchronous>, transform_indices = @transform_1, window_bounds = array<i64: 8, 256>}, {transform_indices = @transform_2, window_bounds = array<i64: 1, 8, 128>}]} {
    %c0 = arith.constant 0 : index
    %c0_0 = arith.constant 0 : index
    %0 = vector.load %arg1[%c0, %c0_0] : memref<8x256xf32, #tpu.memory_space<vmem>>, vector<8x256xf32>
    %c0_1 = arith.constant 0 : index
    %c0_2 = arith.constant 0 : index
    %1 = vector.load %arg2[%c0_1, %c0_2] : memref<8x256xf32, #tpu.memory_space<vmem>>, vector<1x256xf32>
    %c1 = arith.constant 1 : index
    %c0_3 = arith.constant 0 : index
    %2 = vector.load %arg2[%c1, %c0_3] : memref<8x256xf32, #tpu.memory_space<vmem>>, vector<1x256xf32>
    %c2 = arith.constant 2 : index
    %c0_4 = arith.constant 0 : index
    %3 = vector.load %arg2[%c2, %c0_4] : memref<8x256xf32, #tpu.memory_space<vmem>>, vector<1x256xf32>
    %c3 = arith.constant 3 : index
    %c0_5 = arith.constant 0 : index
    %4 = vector.load %arg2[%c3, %c0_5] : memref<8x256xf32, #tpu.memory_space<vmem>>, vector<1x256xf32>
    %cst = arith.constant dense<0.000000e+00> : vector<8xf32>
    %5 = vector.multi_reduction <add>, %0, %cst [1] : vector<8x256xf32> to vector<8xf32>
    %6 = vector.shape_cast %5 : vector<8xf32> to vector<8x1xf32>
    %7 = vector.broadcast %1 : vector<1x256xf32> to vector<8x256xf32>
    %8 = arith.mulf %0, %7 : vector<8x256xf32>
    %cst_6 = arith.constant dense<0.000000e+00> : vector<8xf32>
    %9 = vector.multi_reduction <add>, %8, %cst_6 [1] : vector<8x256xf32> to vector<8xf32>
    %10 = vector.shape_cast %9 : vector<8xf32> to vector<8x1xf32>
    %11 = vector.broadcast %2 : vector<1x256xf32> to vector<8x256xf32>
    %12 = arith.mulf %0, %11 : vector<8x256xf32>
    %cst_7 = arith.constant dense<0.000000e+00> : vector<8xf32>
    %13 = vector.multi_reduction <add>, %12, %cst_7 [1] : vector<8x256xf32> to vector<8xf32>
    %14 = vector.shape_cast %13 : vector<8xf32> to vector<8x1xf32>
    %15 = vector.broadcast %3 : vector<1x256xf32> to vector<8x256xf32>
    %16 = arith.mulf %0, %15 : vector<8x256xf32>
    %cst_8 = arith.constant dense<0.000000e+00> : vector<8xf32>
    %17 = vector.multi_reduction <add>, %16, %cst_8 [1] : vector<8x256xf32> to vector<8xf32>
    %18 = vector.shape_cast %17 : vector<8xf32> to vector<8x1xf32>
    %19 = vector.broadcast %4 : vector<1x256xf32> to vector<8x256xf32>
    %20 = arith.mulf %0, %19 : vector<8x256xf32>
    %cst_9 = arith.constant dense<0.000000e+00> : vector<8xf32>
    %21 = vector.multi_reduction <add>, %20, %cst_9 [1] : vector<8x256xf32> to vector<8xf32>
    %22 = vector.shape_cast %21 : vector<8xf32> to vector<8x1xf32>
    %cst_10 = arith.constant 1.000000e+00 : f32
    %23 = vector.broadcast %cst_10 : f32 to vector<8x1xf32>
    %24 = arith.divf %23, %6 : vector<8x1xf32>
    %25 = arith.mulf %10, %10 : vector<8x1xf32>
    %26 = arith.mulf %25, %24 : vector<8x1xf32>
    %27 = arith.subf %18, %26 : vector<8x1xf32>
    %cst_11 = arith.constant 3.906250e-03 : f32
    %28 = vector.broadcast %cst_11 : f32 to vector<8x1xf32>
    %29 = arith.mulf %27, %28 : vector<8x1xf32>
    %30 = arith.mulf %14, %14 : vector<8x1xf32>
    %31 = arith.mulf %30, %24 : vector<8x1xf32>
    %32 = arith.subf %22, %31 : vector<8x1xf32>
    %cst_12 = arith.constant 3.906250e-03 : f32
    %33 = vector.broadcast %cst_12 : f32 to vector<8x1xf32>
    %34 = arith.mulf %32, %33 : vector<8x1xf32>
    %35 = arith.addf %29, %34 : vector<8x1xf32>
    %c8_i32 = arith.constant 8 : i32
    %36 = arith.muli %arg0, %c8_i32 : i32
    %37 = tpu.iota {dimensions = array<i32: 0>} : vector<8x1xi32>
    %38 = vector.broadcast %36 : i32 to vector<8x1xi32>
    %39 = arith.addi %38, %37 : vector<8x1xi32>
    %c6_i32 = arith.constant 6 : i32
    %40 = vector.broadcast %c6_i32 : i32 to vector<8x1xi32>
    %41 = arith.cmpi slt, %39, %40 : vector<8x1xi32>
    %cst_13 = arith.constant 0.000000e+00 : f32
    %42 = vector.broadcast %cst_13 : f32 to vector<8x1xf32>
    %43 = arith.select %41, %35, %42 : vector<8x1xi1>, vector<8x1xf32>
    %cst_14 = arith.constant dense<0.000000e+00> : vector<1xf32>
    %44 = vector.multi_reduction <add>, %43, %cst_14 [0] : vector<8x1xf32> to vector<1xf32>
    %45 = vector.shape_cast %44 : vector<1xf32> to vector<1x1xf32>
    %46 = vector.shape_cast %45 : vector<1x1xf32> to vector<1x1x1xf32>
    %47 = vector.shape_cast %46 : vector<1x1x1xf32> to vector<1x1x1xf32>
    %48 = vector.broadcast %47 : vector<1x1x1xf32> to vector<1x8x128xf32>
    %c0_15 = arith.constant 0 : index
    %c0_16 = arith.constant 0 : index
    %c0_17 = arith.constant 0 : index
    %49 = vector.load %arg3[%c0_15, %c0_16, %c0_17] : memref<1x8x128xf32, #tpu.memory_space<vmem>>, vector<1x8x128xf32>
    tpu.vector_store %arg3[%c0_15, %c0_16, %c0_17], %48 {strides = array<i32>} : memref<1x8x128xf32, #tpu.memory_space<vmem>>, vector<1x8x128xf32>,
    return
  }
  func.func @transform_0(%arg0: i32) -> (i32, i32) {
    %c0_i32 = arith.constant 0 : i32
    %c0_i32_0 = arith.constant 0 : i32
    return %arg0, %c0_i32 : i32, i32
  }
  func.func @transform_1(%arg0: i32) -> (i32, i32) {
    %c0_i32 = arith.constant 0 : i32
    %c0_i32_0 = arith.constant 0 : i32
    %c0_i32_1 = arith.constant 0 : i32
    return %c0_i32, %c0_i32_0 : i32, i32
  }
  func.func @transform_2(%arg0: i32) -> (i32, i32, i32) {
    %c0_i32 = arith.constant 0 : i32
    %c0_i32_0 = arith.constant 0 : i32
    %c0_i32_1 = arith.constant 0 : i32
    return %arg0, %c0_i32, %c0_i32_0 : i32, i32, i32
  }
}

</mosaic_0001>

<bundles_post_ra>
// kernel: mul.10
= control target key start
LH: loop header
LB: loop body
LE: loop exit
PB: predicated region body
PF: predicated region fallthrough
CT: control target
= control target key end

     0   :  { %s56_s0 = inlined_call_operand.vmem [shape: f32[1,256], index: 0, kind: input, shape index: {}, may-alias: {0,1}]   ;;  %s57_s1 = inlined_call_operand.vmem [shape: f32[1,256], index: 1, kind: input, shape index: {}, may-alias: {0,1}]   ;;  %s58_s2 = inlined_call_operand.vmem [shape: f32[1,256], index: 2, kind: output, shape index: {}]  }
   0x1   :  { %v3_v0 = vld [vmem:[%s56_s0] sm:$0x1]  ;;  %v20_v2 = vld [vmem:[%s56_s0 + $0x1] sm:$0x1] }
   0x2   :  { %v4_v1 = vld [vmem:[%s57_s1] sm:$0x1]  ;;  %v21_v4 = vld [vmem:[%s57_s1 + $0x1] sm:$0x1] }
   0x3   :  { %v7_v3 = vmul.f32 %v4_v1, %v3_v0  ;;  %v16_v5 = vmul.f32 %v21_v4, %v20_v2 }
   0x5   :  { %9 = vst [vmem:[%s58_s2] sm:$0x1] %v7_v3  ;;  %22 = vst [vmem:[%s58_s2 + $0x1] sm:$0x1] %v16_v5 }

// kernel: concentration_loss.1
= control target key start
LH: loop header
LB: loop body
LE: loop exit
PB: predicated region body
PF: predicated region fallthrough
CT: control target
= control target key end

     0   :  { %v24_v0 = vlaneseq  ;;  %s157_s0 = inlined_call_operand.vmem [shape: f32[8,256], index: 0, kind: input, shape index: {}]   ;;  %s158_s1 = inlined_call_operand.vmem [shape: f32[8,256], index: 1, kind: input, shape index: {}]   ;;  %s159_s2 = inlined_call_operand.vmem [shape: f32[1,8,128], index: 2, kind: output, shape index: {}]  }
   0x1   :  { %v11_v1 = vld [vmem:[%s157_s0] sm:$0xff]  ;;  %v12_v2 = vld [vmem:[%s157_s0 + $0x8] sm:$0xff] }
   0x2   :  { %v20_v3 = vadd.f32 %v12_v2, %v11_v1  ;;  %v116_v4 = vld [vmem:[%s158_s1 + $0x1] ss:$8 sm:$0x3]  ;;  %v25_v5 = vshrl.u32 %v24_v0, 7 }
   0x3   :  { %v13_v6 = vld [vmem:[%s158_s1] ss:$8 sm:$0x3]  ;;  %v117_v7 = vld [vmem:[%s158_s1 + $0x2] ss:$8 sm:$0x3] }
   0x4   :  { %21 = vadd.xlane.f32.xlu0 %v20_v3  ;;  %v26_v8 = vsub.s32 0, %v25_v5  ;;  %v30_v9 = vsub.s32 1, %v25_v5  ;;  %v118_v10 = vld [vmem:[%s158_s1 + $0x3] ss:$8 sm:$0x3]  ;;  %vm103_vm0 = vcmp.lt.s32.totalorder %v25_v5, 6 }
   0x6   :  { %v43_v11 = vrot.slane %v116_v4, %v26_v8  ;;  %v47_v12 = vrot.slane %v116_v4, %v30_v9  ;;  %v27_v13 = vrot.slane %v13_v6, %v26_v8  ;;  %v31_v14 = vrot.slane %v13_v6, %v30_v9 }
   0x7   :  { %v59_v15 = vrot.slane %v117_v7, %v26_v8  ;;  %v63_v16 = vrot.slane %v117_v7, %v30_v9  ;;  %v75_v17 = vrot.slane %v118_v10, %v26_v8  ;;  %v79_v18 = vrot.slane %v118_v10, %v30_v9 }
   0x8   :  { %v50_v19 = vmul.f32 %v43_v11, %v11_v1  ;;  %v51_v20 = vmul.f32 %v47_v12, %v12_v2  ;;  %v34_v21 = vmul.f32 %v27_v13, %v11_v1  ;;  %v35_v22 = vmul.f32 %v31_v14, %v12_v2 }
   0x9   :  { %v66_v23 = vmul.f32 %v59_v15, %v11_v1  ;;  %v67_v24 = vmul.f32 %v63_v16, %v12_v2  ;;  %v82_v25 = vmul.f32 %v75_v17, %v11_v1  ;;  %v83_v26 = vmul.f32 %v79_v18, %v12_v2 }
   0xa   :  { %v52_v27 = vadd.f32 %v51_v20, %v50_v19  ;;  %v36_v28 = vadd.f32 %v35_v22, %v34_v21 }
   0xb   :  { %v68_v29 = vadd.f32 %v67_v24, %v66_v23  ;;  %v84_v30 = vadd.f32 %v83_v26, %v82_v25 }
   0xc   :  { %53 = vadd.xlane.f32.xlu1 %v52_v27  ;;  %37 = vadd.xlane.f32.xlu0 %v36_v28 }
  0x10   :  { %69 = vadd.xlane.f32.xlu1 %v68_v29  ;;  %85 = vadd.xlane.f32.xlu0 %v84_v30 }
  0x8d   :  { %v22_v31 = vpop.xlane.xlu0 %21 }
  0x8e   :  { %119 = vrcp.f32 %v22_v31 }
  0x95   :  { %v54_v32 = vpop.xlane.xlu1 %53  ;;  %v38_v33 = vpop.xlane.xlu0 %37 }
  0x96   :  { %v93_v34 = vmul.f32 %v54_v32, %v54_v32  ;;  %v89_v35 = vmul.f32 %v38_v33, %v38_v33 }
  0x99   :  { %v70_v37 = vpop.xlane.xlu1 %69  ;;  %v86_v38 = vpop.xlane.xlu0 %85 }
  0x9b   :  { %v120_v36 = vpop.eup %119 }
  0x9c   :  { %v90_v39 = vmul.f32 %v120_v36, %v89_v35  ;;  %v94_v40 = vmul.f32 %v120_v36, %v93_v34 }
  0x9e   :  { %v91_v41 = vsub.f32 %v70_v37, %v90_v39  ;;  %v95_v42 = vsub.f32 %v86_v38, %v94_v40 }
  0xa0   :  { %v92_v43 = vmul.f32 0.00390625, %v91_v41  ;;  %v96_v44 = vmul.f32 0.00390625, %v95_v42 }
  0xa2   :  { %v97_v45 = vadd.f32 %v96_v44, %v92_v43 }
  0xa4   :  { %v104_v46 = vsel %vm103_vm0, %v97_v45, 0.0 }
  0xa5   :  { %v105_v47 = vrot.slane %v104_v46, 4 }
  0xa7   :  { %v106_v48 = vadd.f32 %v105_v47, %v104_v46 }
  0xa9   :  { %v107_v49 = vrot.slane %v106_v48, 2 }
  0xab   :  { %v108_v50 = vadd.f32 %v107_v49, %v106_v48 }
  0xad   :  { %v109_v51 = vrot.slane %v108_v50, 1 }
  0xaf   :  { %v110_v52 = vadd.f32 %v109_v51, %v108_v50 }
  0xb1   :  { %111 = vst [vmem:[%s159_s2] sm:$0xff] %v110_v52 }

</bundles_post_ra>
